<compile_context>
chip_gen: v7x
topology: tpu7x:2x2x1
jax: 0.10.0
libtpu: 0.0.40
codegen_flags: <defaults>
</compile_context>

<pallas_src>
import functools

import jax
import jax.numpy as jnp
from jax.experimental import pallas as pl
from jax.experimental.pallas import tpu as pltpu


def _round_up(x: int, m: int) -> int:
    return (x + m - 1) // m * m


def _cdiv(a: int, b: int) -> int:
    return (a + b - 1) // b


# Below this many rows, splitting a single block across two grid steps is pure
# per-step overhead (the v7x two-TensorCore split only pays off for large batches).
_MIN_SPLIT_ROWS = 1024


def _mlp_kernel(x_ref, w1_ref, b1_ref, w2_ref, b2_ref, w3_ref, b3_ref, o_ref):
    # Three fused MXU matmuls on one VMEM-resident row tile.
    # Operands are bf16 (MXU-native on v5e/v6e/v7x); accumulation stays f32 via
    # preferred_element_type.  ReLU runs on the f32 accumulator *before* the bf16
    # downcast (v5e's VPU has no bf16 ALU; costs nothing on v6e/v7x).
    x = x_ref[...].astype(jnp.bfloat16)
    h = jnp.dot(x, w1_ref[...], preferred_element_type=jnp.float32) + b1_ref[...]
    h = jnp.maximum(h, 0.0).astype(jnp.bfloat16)
    h = jnp.dot(h, w2_ref[...], preferred_element_type=jnp.float32) + b2_ref[...]
    h = jnp.maximum(h, 0.0).astype(jnp.bfloat16)
    out = jnp.dot(h, w3_ref[...], preferred_element_type=jnp.float32) + b3_ref[...]
    # TODO(synk): benchmark reinterpreting the skinny (tm, out_ch) store as a lane-dense
    # (tm//4, out_ch*4) block (in-kernel reshape + free wrapper reshape-back) to turn the
    # width-32 masked vst.msk stores into full-width stores with no extra HBM bytes.
    o_ref[...] = out.astype(o_ref.dtype)


@functools.partial(jax.jit, static_argnames=("tile_m", "out_dtype"))
def discriminator_forward(x, w1, b1, w2, b2, w3, b3, *, tile_m=4096, out_dtype=None):
    N, in_ch = x.shape
    hid = w1.shape[1]
    out_ch = w3.shape[1]
    out_dtype = x.dtype if out_dtype is None else out_dtype

    # Row tile.  No wrapper-side padding: a cdiv grid with a masked partial last block
    # is used instead.  Blocks never exceed the array extent:
    #   * if one block covers the whole batch, the block row-dim equals N exactly
    #     (a block dim equal to the full array dim is always legal), or
    #   * the block row-dim is a multiple of 8 that is < N (partial last block is masked).
    if _round_up(tile_m, 8) >= N:
        tm = N
    else:
        tm = _round_up(tile_m, 8)
    steps = _cdiv(N, tm)
    # v7x: two TensorCores share the "parallel" grid axis -> keep the step count even
    # (and >= 2 for large batches) so neither core idles.  Harmless on v5e/v6e.
    if steps == 1 and N >= 2 * _MIN_SPLIT_ROWS:
        tm = _round_up(_cdiv(N, 2), 8)
    elif steps > 1 and steps % 2 == 1:
        tm = _round_up(_cdiv(N, steps + 1), 8)
    grid = (_cdiv(N, tm),)

    # Pre-cast weights to bf16 once here (they are tiny and grid-invariant; an in-kernel
    # cast would redo it every grid step).  x stays f32 in HBM and is cast in-kernel:
    # a wrapper-side cast of x would be a separate XLA op with a full extra HBM round
    # trip of x, strictly worse for an HBM-bound kernel.
    w1b = w1.astype(jnp.bfloat16)
    w2b = w2.astype(jnp.bfloat16)
    w3b = w3.astype(jnp.bfloat16)
    b1f = b1.reshape(1, hid).astype(jnp.float32)
    b2f = b2.reshape(1, hid).astype(jnp.float32)
    b3f = b3.reshape(1, out_ch).astype(jnp.float32)

    # Weights/biases are grid-invariant (constant index_map) -> kept VMEM-resident.
    full = lambda shape: pl.BlockSpec(shape, lambda i: (0, 0))

    return pl.pallas_call(
        _mlp_kernel,
        out_shape=jax.ShapeDtypeStruct((N, out_ch), out_dtype),
        grid_spec=pltpu.PrefetchScalarGridSpec(
            num_scalar_prefetch=0,
            grid=grid,
            in_specs=[
                pl.BlockSpec((tm, in_ch), lambda i: (i, 0)),  # x row tile
                full((in_ch, hid)),    # W1
                full((1, hid)),        # b1
                full((hid, hid)),      # W2
                full((1, hid)),        # b2
                full((hid, out_ch)),   # W3
                full((1, out_ch)),     # b3
            ],
            out_specs=pl.BlockSpec((tm, out_ch), lambda i: (i, 0)),
        ),
        compiler_params=pltpu.CompilerParams(
            dimension_semantics=("parallel",),
            # Double-buffered x/out tiles + f32 intermediates + resident weights stay
            # well below 32 MiB even at tile_m=8192; the explicit cap keeps this tiling
            # safe on v7x's 64 MiB VMEM (raise toward 64 MiB on v5e/v6e if pushing tm up).
            vmem_limit_bytes=32 * 1024 * 1024,
        ),
    )(x, w1b, b1f, w2b, b2f, w3b, b3f)


def _init_linear(key, fan_in, fan_out, dtype=jnp.float32):
    # Deterministic synthetic init mirroring PyTorch Linear's uniform(-1/sqrt(fan_in), ...).
    kw, kb = jax.random.split(key)
    bound = 1.0 / jnp.sqrt(jnp.float32(fan_in))
    w = jax.random.uniform(kw, (fan_in, fan_out), dtype, minval=-bound, maxval=bound)
    b = jax.random.uniform(kb, (fan_out,), dtype, minval=-bound, maxval=bound)
    return w, b


def _reference(x, w1, b1, w2, b2, w3, b3):
    h = jnp.maximum(x @ w1 + b1, 0.0)
    h = jnp.maximum(h @ w2 + b2, 0.0)
    return h @ w3 + b3


if __name__ == "__main__":
    key = jax.random.PRNGKey(0)
    k_x, k1, k2, k3 = jax.random.split(key, 4)

    # Shapes matching the PyG example: Discriminator(32, 64, 32).
    in_ch, hid, out_ch = 32, 64, 32

    w1, b1 = _init_linear(k1, in_ch, hid)
    w2, b2 = _init_linear(k2, hid, hid)
    w3, b3 = _init_linear(k3, hid, out_ch)

    configs = [
        dict(N=200, tile_m=4096),                          # single exact block (tm clamped to N)
        dict(N=200, tile_m=64),                            # multi-step grid, partial last block
        dict(N=203, tile_m=64),                            # N not a multiple of 8: masked tail rows
        dict(N=200, tile_m=4096, out_dtype=jnp.bfloat16),  # bf16 writeback variant
    ]
    for cfg in configs:
        N = cfg.pop("N")
        x = jax.random.normal(jax.random.fold_in(k_x, N), (N, in_ch), jnp.float32)
        ref = _reference(x, w1, b1, w2, b2, w3, b3)

        out = discriminator_forward(x, w1, b1, w2, b2, w3, b3, **cfg)
        out = jax.block_until_ready(out)
        assert out.shape == (N, out_ch), (out.shape, cfg)
        # bf16 MXU operands (and optionally bf16 output) vs f32 reference -> loose tolerance.
        assert jnp.allclose(out.astype(jnp.float32), ref, atol=5e-2, rtol=5e-2), \
            f"mismatch vs reference: {cfg}"

    print("KERNEL_OK")
</pallas_src>

<mosaic_0001>
module attributes {stable_mosaic.version = 11 : i64} {
  func.func @_mlp_kernel(%arg0: i32, %arg1: memref<200x32xf32, #tpu.memory_space<vmem>>, %arg2: memref<32x64xbf16, #tpu.memory_space<vmem>>, %arg3: memref<1x64xf32, #tpu.memory_space<vmem>>, %arg4: memref<64x64xbf16, #tpu.memory_space<vmem>>, %arg5: memref<1x64xf32, #tpu.memory_space<vmem>>, %arg6: memref<64x32xbf16, #tpu.memory_space<vmem>>, %arg7: memref<1x32xf32, #tpu.memory_space<vmem>>, %arg8: memref<200x32xf32, #tpu.memory_space<vmem>>) attributes {dimension_semantics = [#tpu.dimension_semantics<parallel>], iteration_bounds = array<i64: 1>, scalar_prefetch = 0 : i64, scratch_operands = 0 : i64, tpu.core_type = #tpu.core_type<tc>, window_params = [{transform_indices = @transform_0, window_bounds = array<i64: 200, 32>}, {pipeline_mode = #tpu.pipeline_mode<synchronous>, transform_indices = @transform_1, window_bounds = array<i64: 32, 64>}, {pipeline_mode = #tpu.pipeline_mode<synchronous>, transform_indices = @transform_2, window_bounds = array<i64: 1, 64>}, {pipeline_mode = #tpu.pipeline_mode<synchronous>, transform_indices = @transform_3, window_bounds = array<i64: 64, 64>}, {pipeline_mode = #tpu.pipeline_mode<synchronous>, transform_indices = @transform_4, window_bounds = array<i64: 1, 64>}, {pipeline_mode = #tpu.pipeline_mode<synchronous>, transform_indices = @transform_5, window_bounds = array<i64: 64, 32>}, {pipeline_mode = #tpu.pipeline_mode<synchronous>, transform_indices = @transform_6, window_bounds = array<i64: 1, 32>}, {transform_indices = @transform_7, window_bounds = array<i64: 200, 32>}]} {
    %c0 = arith.constant 0 : index
    %c0_0 = arith.constant 0 : index
    %0 = vector.load %arg1[%c0, %c0_0] : memref<200x32xf32, #tpu.memory_space<vmem>>, vector<200x32xf32>
    %1 = arith.truncf %0 : vector<200x32xf32> to vector<200x32xbf16>
    %c0_1 = arith.constant 0 : index
    %c0_2 = arith.constant 0 : index
    %2 = vector.load %arg2[%c0_1, %c0_2] : memref<32x64xbf16, #tpu.memory_space<vmem>>, vector<32x64xbf16>
    %cst = arith.constant dense<0.000000e+00> : vector<200x64xf32>
    %3 = tpu.matmul %1, %2, %cst {dimension_numbers = #tpu.dot_dimension_numbers<[1], [0], [0], [1], [0, 0, 1, 1], [], []>} : vector<200x32xbf16>, vector<32x64xbf16>, vector<200x64xf32> -> vector<200x64xf32>
    %c0_3 = arith.constant 0 : index
    %c0_4 = arith.constant 0 : index
    %4 = vector.load %arg3[%c0_3, %c0_4] : memref<1x64xf32, #tpu.memory_space<vmem>>, vector<1x64xf32>
    %5 = vector.broadcast %4 : vector<1x64xf32> to vector<200x64xf32>
    %6 = arith.addf %3, %5 : vector<200x64xf32>
    %cst_5 = arith.constant 0.000000e+00 : f32
    %7 = vector.broadcast %cst_5 : f32 to vector<200x64xf32>
    %8 = arith.maximumf %6, %7 : vector<200x64xf32>
    %9 = arith.truncf %8 : vector<200x64xf32> to vector<200x64xbf16>
    %c0_6 = arith.constant 0 : index
    %c0_7 = arith.constant 0 : index
    %10 = vector.load %arg4[%c0_6, %c0_7] : memref<64x64xbf16, #tpu.memory_space<vmem>>, vector<64x64xbf16>
    %cst_8 = arith.constant dense<0.000000e+00> : vector<200x64xf32>
    %11 = tpu.matmul %9, %10, %cst_8 {dimension_numbers = #tpu.dot_dimension_numbers<[1], [0], [0], [1], [0, 0, 1, 1], [], []>} : vector<200x64xbf16>, vector<64x64xbf16>, vector<200x64xf32> -> vector<200x64xf32>
    %c0_9 = arith.constant 0 : index
    %c0_10 = arith.constant 0 : index
    %12 = vector.load %arg5[%c0_9, %c0_10] : memref<1x64xf32, #tpu.memory_space<vmem>>, vector<1x64xf32>
    %13 = vector.broadcast %12 : vector<1x64xf32> to vector<200x64xf32>
    %14 = arith.addf %11, %13 : vector<200x64xf32>
    %cst_11 = arith.constant 0.000000e+00 : f32
    %15 = vector.broadcast %cst_11 : f32 to vector<200x64xf32>
    %16 = arith.maximumf %14, %15 : vector<200x64xf32>
    %17 = arith.truncf %16 : vector<200x64xf32> to vector<200x64xbf16>
    %c0_12 = arith.constant 0 : index
    %c0_13 = arith.constant 0 : index
    %18 = vector.load %arg6[%c0_12, %c0_13] : memref<64x32xbf16, #tpu.memory_space<vmem>>, vector<64x32xbf16>
    %cst_14 = arith.constant dense<0.000000e+00> : vector<200x32xf32>
    %19 = tpu.matmul %17, %18, %cst_14 {dimension_numbers = #tpu.dot_dimension_numbers<[1], [0], [0], [1], [0, 0, 1, 1], [], []>} : vector<200x64xbf16>, vector<64x32xbf16>, vector<200x32xf32> -> vector<200x32xf32>
    %c0_15 = arith.constant 0 : index
    %c0_16 = arith.constant 0 : index
    %20 = vector.load %arg7[%c0_15, %c0_16] : memref<1x32xf32, #tpu.memory_space<vmem>>, vector<1x32xf32>
    %21 = vector.broadcast %20 : vector<1x32xf32> to vector<200x32xf32>
    %22 = arith.addf %19, %21 : vector<200x32xf32>
    %c0_17 = arith.constant 0 : index
    %c0_18 = arith.constant 0 : index
    %23 = vector.load %arg8[%c0_17, %c0_18] : memref<200x32xf32, #tpu.memory_space<vmem>>, vector<200x32xf32>
    tpu.vector_store %arg8[%c0_17, %c0_18], %22 {strides = array<i32>} : memref<200x32xf32, #tpu.memory_space<vmem>>, vector<200x32xf32>,
    return
  }
  func.func @transform_0(%arg0: i32) -> (i32, i32) {
    %c0_i32 = arith.constant 0 : i32
    %c0_i32_0 = arith.constant 0 : i32
    return %arg0, %c0_i32 : i32, i32
  }
  func.func @transform_1(%arg0: i32) -> (i32, i32) {
    %c0_i32 = arith.constant 0 : i32
    %c0_i32_0 = arith.constant 0 : i32
    %c0_i32_1 = arith.constant 0 : i32
    return %c0_i32, %c0_i32_0 : i32, i32
  }
  func.func @transform_2(%arg0: i32) -> (i32, i32) {
    %c0_i32 = arith.constant 0 : i32
    %c0_i32_0 = arith.constant 0 : i32
    %c0_i32_1 = arith.constant 0 : i32
    return %c0_i32, %c0_i32_0 : i32, i32
  }
  func.func @transform_3(%arg0: i32) -> (i32, i32) {
    %c0_i32 = arith.constant 0 : i32
    %c0_i32_0 = arith.constant 0 : i32
    %c0_i32_1 = arith.constant 0 : i32
    return %c0_i32, %c0_i32_0 : i32, i32
  }
  func.func @transform_4(%arg0: i32) -> (i32, i32) {
    %c0_i32 = arith.constant 0 : i32
    %c0_i32_0 = arith.constant 0 : i32
    %c0_i32_1 = arith.constant 0 : i32
    return %c0_i32, %c0_i32_0 : i32, i32
  }
  func.func @transform_5(%arg0: i32) -> (i32, i32) {
    %c0_i32 = arith.constant 0 : i32
    %c0_i32_0 = arith.constant 0 : i32
    %c0_i32_1 = arith.constant 0 : i32
    return %c0_i32, %c0_i32_0 : i32, i32
  }
  func.func @transform_6(%arg0: i32) -> (i32, i32) {
    %c0_i32 = arith.constant 0 : i32
    %c0_i32_0 = arith.constant 0 : i32
    %c0_i32_1 = arith.constant 0 : i32
    return %c0_i32, %c0_i32_0 : i32, i32
  }
  func.func @transform_7(%arg0: i32) -> (i32, i32) {
    %c0_i32 = arith.constant 0 : i32
    %c0_i32_0 = arith.constant 0 : i32
    return %arg0, %c0_i32 : i32, i32
  }
}

</mosaic_0001>

<bundles_post_ra>
// kernel: discriminator_forward.1
= control target key start
LH: loop header
LB: loop body
LE: loop exit
PB: predicated region body
PF: predicated region fallthrough
CT: control target
= control target key end

     0   :  { %v1091_v0 = vmov 0.0   ;;  %vm1092_vm0 = vmmov 0   ;;  %vm88_vm1 = vcmask 261120   ;;  %vm341_vm2 = vcmask 523264   ;;  %s1566_s1 = inlined_call_operand.vmem [shape: bf16[32,64], index: 1, kind: input, shape index: {}]   ;;  %s1567_s0 = inlined_call_operand.vmem [shape: f32[200,32], index: 0, kind: input, shape index: {}]   ;;  %s1568_s3 = inlined_call_operand.vmem [shape: bf16[64,64], index: 3, kind: input, shape index: {}]   ;;  %s1569_s5 = inlined_call_operand.vmem [shape: bf16[64,32], index: 5, kind: input, shape index: {}]   ;;  %s1570_s2 = inlined_call_operand.vmem [shape: f32[1,64], index: 2, kind: input, shape index: {}]   ;;  %s1571_s4 = inlined_call_operand.vmem [shape: f32[1,64], index: 4, kind: input, shape index: {}]   ;;  %s1572_s6 = inlined_call_operand.vmem [shape: f32[1,32], index: 6, kind: input, shape index: {}]   ;;  %s1573_s7 = inlined_call_operand.vmem [shape: f32[200,32], index: 7, kind: output, shape index: {}]  }
   0x1   :  { %899 = vmatprep.subr.bf16.mxu0 %v1091_v0  ;;  %v1081_v1 = vld [vmem:[%s1566_s1] sm:$0xff]   ;;  %903 = vmatprep.mubr.msk.bf16.mxu0 %vm1092_vm0, %v1091_v0  ;;  %v1082_v2 = vld [vmem:[%s1566_s1 + $0x8] sm:$0xff]   ;;  %v41_v6 = vld [vmem:[%s1567_s0 + $0x70] sm:$0xff] }
   0x2   :  { %1075 = vmatprep.subr.bf16.mxu1 %v1091_v0  ;;  %931 = vmatprep.mubr.msk.bf16.mxu1 %vm1092_vm0, %v1091_v0  ;;  %v27_v3 = vld [vmem:[%s1567_s0] sm:$0xff]  ;;  %v28_v4 = vld [vmem:[%s1567_s0 + $0x8] sm:$0xff]  ;;  %v42_v7 = vld [vmem:[%s1567_s0 + $0x78] sm:$0xff] }
   0x3   :  { %900 = vmatpush3.bf16.msra.mxu0 %v1081_v1  ;;  %1077 = vmatpush3.bf16.msra.mxu1 %v1081_v1  ;;  %v52_v5 = vpack.c.bf16 %v28_v4, %v27_v3  ;;  %v59_v8 = vpack.c.bf16 %v42_v7, %v41_v6  ;;  %v29_v9 = vld [vmem:[%s1567_s0 + $0x10] sm:$0xff]  ;;  %v30_v10 = vld [vmem:[%s1567_s0 + $0x18] sm:$0xff]  ;;  %v43_v11 = vld [vmem:[%s1567_s0 + $0x80] sm:$0xff] }
   0x4   :  { %901 = vmatprep.subr.bf16.mxu0 %v1091_v0  ;;  %1076 = vmatprep.subr.bf16.mxu1 %v1091_v0  ;;  %v44_v12 = vld [vmem:[%s1567_s0 + $0x88] sm:$0xff]  ;;  %v1083_v13 = vld [vmem:[%s1568_s3] sm:$0xff]   ;;  %v53_v14 = vpack.c.bf16 %v30_v10, %v29_v9  ;;  %v1085_v17 = vld [vmem:[%s1568_s3 + $0x10] sm:$0xff]  }
   0x5   :  { %v1084_v15 = vld [vmem:[%s1568_s3 + $0x8] sm:$0xff]   ;;  %v60_v16 = vpack.c.bf16 %v44_v12, %v43_v11  ;;  %v31_v18 = vld [vmem:[%s1567_s0 + $0x20] sm:$0xff]  ;;  %v45_v20 = vld [vmem:[%s1567_s0 + $0x90] sm:$0xff] }
   0x6   :  { %v32_v19 = vld [vmem:[%s1567_s0 + $0x28] sm:$0xff]  ;;  %v46_v21 = vld [vmem:[%s1567_s0 + $0x98] sm:$0xff]  ;;  %v33_v25 = vld [vmem:[%s1567_s0 + $0x30] sm:$0xff] }
   0x7   :  { %902 = vmatpush3.bf16.msra.mxu0 %v1082_v2  ;;  %1078 = vmatpush3.bf16.msra.mxu1 %v1082_v2  ;;  %v54_v22 = vpack.c.bf16 %v32_v19, %v31_v18  ;;  %v1086_v23 = vld [vmem:[%s1568_s3 + $0x18] sm:$0xff]   ;;  %v61_v24 = vpack.c.bf16 %v46_v21, %v45_v20  ;;  %v47_v27 = vld [vmem:[%s1567_s0 + $0xa0] sm:$0xff]  ;;  %v48_v28 = vld [vmem:[%s1567_s0 + $0xa8] sm:$0xff] }
   0x8   :  { %955 = vmatprep.subr.bf16.mxu1 %v1091_v0  ;;  %1015 = vmatprep.subr.bf16.mxu0 %v1091_v0  ;;  %v34_v26 = vld [vmem:[%s1567_s0 + $0x38] sm:$0xff]  ;;  %v62_v30 = vpack.c.bf16 %v48_v28, %v47_v27  ;;  %v35_v31 = vld [vmem:[%s1567_s0 + $0x40] sm:$0xff]  ;;  %v36_v32 = vld [vmem:[%s1567_s0 + $0x48] sm:$0xff] }
   0x9   :  { %v55_v29 = vpack.c.bf16 %v34_v26, %v33_v25  ;;  %v49_v33 = vld [vmem:[%s1567_s0 + $0xb0] sm:$0xff]  ;;  %v50_v34 = vld [vmem:[%s1567_s0 + $0xb8] sm:$0xff]  ;;  %v56_v35 = vpack.c.bf16 %v36_v32, %v35_v31  ;;  %v51_v39 = vld [vmem:[%s1567_s0 + $0xc0] sm:$0xff] }
   0xa   :  { %904 = vmatmul.mubr.msk.bf16.vlgmr.msra.gmra.mrb[0].mxu0 %vm88_vm1, %v52_v5  ;;  %932 = vmatmul.mubr.msk.bf16.vlgmr.msra.gmra.mrb[0].mxu1 %vm88_vm1, %v59_v8  ;;  %v63_v36 = vpack.c.bf16 %v50_v34, %v49_v33  ;;  %v37_v37 = vld [vmem:[%s1567_s0 + $0x50] sm:$0xff]  ;;  %v38_v38 = vld [vmem:[%s1567_s0 + $0x58] sm:$0xff]  ;;  %v64_v41 = vpack.c.bf16 %v51_v39, %v51_v39  ;;  %v39_v42 = vld [vmem:[%s1567_s0 + $0x60] sm:$0xff] }
   0xb   :  { %907 = vmatprep.mubr.msk.bf16.mxu0 %vm1092_vm0, %v1091_v0  ;;  %935 = vmatprep.mubr.msk.bf16.mxu1 %vm1092_vm0, %v1091_v0  ;;  %v57_v40 = vpack.c.bf16 %v38_v38, %v37_v37  ;;  %v40_v43 = vld [vmem:[%s1567_s0 + $0x68] sm:$0xff]  ;;  %v1087_v45 = vld [vmem:[%s1569_s5] sm:$0xff]   ;;  %v1089_v47 = vld [vmem:[%s1569_s5 + $0x10] sm:$0xff]  }
   0xc   :  { %956 = vmatpush3.bf16.msra.mxu1 %v1083_v13  ;;  %v58_v44 = vpack.c.bf16 %v40_v43, %v39_v42  ;;  %1016 = vmatpush3.bf16.msra.mxu0 %v1087_v45  ;;  %v1088_v46 = vld [vmem:[%s1569_s5 + $0x8] sm:$0xff]   ;;  %v1090_v48 = vld [vmem:[%s1569_s5 + $0x18] sm:$0xff]   ;;  %v1296_v49 = vld [vmem:[%s1570_s2] ss:$0 sm:$0xff] }
   0xd   :  { %957 = vmatprep.subr.bf16.mxu1 %v1091_v0  ;;  %1017 = vmatprep.subr.bf16.mxu0 %v1091_v0 }
  0x10   :  { %958 = vmatpush3.bf16.msra.mxu1 %v1084_v15  ;;  %1018 = vmatpush3.bf16.msra.mxu0 %v1088_v46 }
  0x11   :  { %959 = vmatprep.subr.bf16.mxu1 %v1091_v0  ;;  %1019 = vmatprep.subr.bf16.mxu0 %v1091_v0 }
  0x12   :  { %908 = vmatmul.mubr.msk.bf16.gmra.mrb[4].mxu0 %vm88_vm1, %v53_v14  ;;  %936 = vmatmul.mubr.msk.bf16.gmra.mrb[4].mxu1 %vm88_vm1, %v60_v16 }
  0x13   :  { %911 = vmatprep.mubr.msk.bf16.mxu0 %vm1092_vm0, %v1091_v0  ;;  %939 = vmatprep.mubr.msk.bf16.mxu1 %vm1092_vm0, %v1091_v0 }
  0x14   :  { %960 = vmatpush3.bf16.msra.mxu1 %v1085_v17  ;;  %1020 = vmatpush3.bf16.msra.mxu0 %v1089_v47 }
  0x15   :  { %961 = vmatprep.subr.bf16.mxu1 %v1091_v0  ;;  %1021 = vmatprep.subr.bf16.mxu0 %v1091_v0 }
  0x18   :  { %962 = vmatpush3.bf16.msra.mxu1 %v1086_v23  ;;  %1022 = vmatpush3.bf16.msra.mxu0 %v1090_v48 }
  0x1a   :  { %912 = vmatmul.mubr.msk.bf16.gmra.mrb[8].mxu0 %vm88_vm1, %v54_v22  ;;  %940 = vmatmul.mubr.msk.bf16.gmra.mrb[8].mxu1 %vm88_vm1, %v61_v24 }
  0x1b   :  { %915 = vmatprep.mubr.msk.bf16.mxu0 %vm1092_vm0, %v1091_v0  ;;  %943 = vmatprep.mubr.msk.bf16.mxu1 %vm1092_vm0, %v1091_v0 }
  0x22   :  { %916 = vmatmul.mubr.msk.bf16.gmra.mrb[12].mxu0 %vm88_vm1, %v55_v29  ;;  %944 = vmatmul.mubr.msk.bf16.gmra.mrb[12].mxu1 %vm88_vm1, %v62_v30 }
  0x23   :  { %919 = vmatprep.mubr.msk.bf16.mxu0 %vm1092_vm0, %v1091_v0  ;;  %947 = vmatprep.mubr.msk.bf16.mxu1 %vm1092_vm0, %v1091_v0 }
  0x2a   :  { %920 = vmatmul.mubr.msk.bf16.gmra.mrb[16].mxu0 %vm88_vm1, %v56_v35  ;;  %948 = vmatmul.mubr.msk.bf16.gmra.mrb[16].mxu1 %vm88_vm1, %v63_v36 }
  0x2b   :  { %923 = vmatprep.mubr.msk.bf16.mxu0 %vm1092_vm0, %v1091_v0  ;;  %951 = vmatprep.mubr.msk.bf16.mxu1 %vm1092_vm0, %v1091_v0 }
  0x32   :  { %924 = vmatmul.mubr.msk.bf16.gmra.mrb[20].mxu0 %vm88_vm1, %v57_v40  ;;  %952 = vmatmul.mubr.msk.bf16.gmra.mrb[20].mxu1 %vm88_vm1, %v64_v41 }
  0x33   :  { %927 = vmatprep.mubr.msk.bf16.mxu0 %vm1092_vm0, %v1091_v0  ;;  %963 = vmatprep.mubr.msk.bf16.mxu1 %vm1092_vm0, %v1091_v0 }
  0x3a   :  { %928 = vmatmul.mubr.msk.bf16.gmra.mrb[24].mxu0 %vm88_vm1, %v58_v44 }
  0x3b   :  { %1023 = vmatprep.mubr.msk.bf16.mxu0 %vm1092_vm0, %v1091_v0 }
  0xdd   :  { %v162_v50 = vpop.f32.mrb[0].mxu0  ;;  %v218_v53 = vpop.f32.mrb[0].mxu1 }
  0xde   :  { %v163_v51 = vadd.f32 %v1296_v49, %v162_v50  ;;  %v905_v52 = vpop.f32.mrb[1].mxu0  ;;  %v219_v55 = vadd.f32 %v1296_v49, %v218_v53  ;;  %v933_v56 = vpop.f32.mrb[1].mxu1 }
  0xdf   :  { %v165_v54 = vpop.f32.mrb[2].mxu0  ;;  %v221_v59 = vpop.f32.mrb[2].mxu1 }
  0xe0   :  { %v166_v57 = vadd.f32 %v1296_v49, %v165_v54  ;;  %v906_v58 = vpop.f32.mrb[3].mxu0  ;;  %v278_v60 = vmax.f32 %v219_v55, 0.0  ;;  %v222_v61 = vadd.f32 %v1296_v49, %v221_v59  ;;  %v934_v62 = vpop.f32.mrb[3].mxu1  ;;  %v264_v63 = vmax.f32 %v163_v51, 0.0 }
  0xe2   :  { %v265_v1 = vmax.f32 %v166_v57, 0.0  ;;  %v279_v2 = vmax.f32 %v222_v61, 0.0 }
  0xe4   :  { %v289_v3 = vpack.c.bf16 %v265_v1, %v264_v63  ;;  %v1302_v5 = vpack.c.bf16 %v279_v2, %v278_v60 }
  0xe5   :  { %v170_v4 = vpop.f32.mrb[4].mxu0  ;;  %v226_v8 = vpop.f32.mrb[4].mxu1 }
  0xe6   :  { %v171_v6 = vadd.f32 %v1296_v49, %v170_v4  ;;  %v909_v7 = vpop.f32.mrb[5].mxu0  ;;  %964 = vmatmul.mubr.msk.bf16.vlgmr.msra.gmra.mrb[24].mxu1 %vm341_vm2, %v289_v3  ;;  %v227_v10 = vadd.f32 %v1296_v49, %v226_v8  ;;  %v937_v11 = vpop.f32.mrb[5].mxu1 }
  0xe7   :  { %v173_v9 = vpop.f32.mrb[6].mxu0  ;;  %967 = vmatprep.mubr.msk.bf16.mxu1 %vm1092_vm0, %v1091_v0  ;;  %v229_v14 = vpop.f32.mrb[6].mxu1 }
  0xe8   :  { %v174_v12 = vadd.f32 %v1296_v49, %v173_v9  ;;  %v910_v13 = vpop.f32.mrb[7].mxu0  ;;  %v280_v15 = vmax.f32 %v227_v10, 0.0  ;;  %v230_v16 = vadd.f32 %v1296_v49, %v229_v14  ;;  %v938_v17 = vpop.f32.mrb[7].mxu1  ;;  %v266_v18 = vmax.f32 %v171_v6, 0.0 }
  0xea   :  { %v267_v19 = vmax.f32 %v174_v12, 0.0  ;;  %v281_v20 = vmax.f32 %v230_v16, 0.0 }
  0xec   :  { %v290_v21 = vpack.c.bf16 %v267_v19, %v266_v18  ;;  %v1311_v23 = vpack.c.bf16 %v281_v20, %v280_v15 }
  0xed   :  { %v178_v22 = vpop.f32.mrb[8].mxu0  ;;  %v234_v26 = vpop.f32.mrb[8].mxu1 }
  0xee   :  { %v179_v24 = vadd.f32 %v1296_v49, %v178_v22  ;;  %v913_v25 = vpop.f32.mrb[9].mxu0  ;;  %968 = vmatmul.mubr.msk.bf16.gmra.mrb[28].mxu1 %vm341_vm2, %v290_v21  ;;  %v235_v28 = vadd.f32 %v1296_v49, %v234_v26  ;;  %v941_v29 = vpop.f32.mrb[9].mxu1 }
  0xef   :  { %v181_v27 = vpop.f32.mrb[10].mxu0  ;;  %971 = vmatprep.mubr.msk.bf16.mxu1 %vm1092_vm0, %v1091_v0  ;;  %v237_v32 = vpop.f32.mrb[10].mxu1 }
  0xf0   :  { %v182_v30 = vadd.f32 %v1296_v49, %v181_v27  ;;  %v914_v31 = vpop.f32.mrb[11].mxu0  ;;  %v282_v33 = vmax.f32 %v235_v28, 0.0  ;;  %v238_v34 = vadd.f32 %v1296_v49, %v237_v32  ;;  %v942_v35 = vpop.f32.mrb[11].mxu1  ;;  %v268_v36 = vmax.f32 %v179_v24, 0.0 }
  0xf2   :  { %v269_v37 = vmax.f32 %v182_v30, 0.0  ;;  %v283_v38 = vmax.f32 %v238_v34, 0.0 }
  0xf4   :  { %v291_v39 = vpack.c.bf16 %v269_v37, %v268_v36  ;;  %v1320_v41 = vpack.c.bf16 %v283_v38, %v282_v33 }
  0xf5   :  { %v186_v40 = vpop.f32.mrb[12].mxu0  ;;  %v242_v44 = vpop.f32.mrb[12].mxu1 }
  0xf6   :  { %v187_v42 = vadd.f32 %v1296_v49, %v186_v40  ;;  %v917_v43 = vpop.f32.mrb[13].mxu0  ;;  %972 = vmatmul.mubr.msk.bf16.gmra.mrb[32].mxu1 %vm341_vm2, %v291_v39  ;;  %v243_v46 = vadd.f32 %v1296_v49, %v242_v44  ;;  %v945_v47 = vpop.f32.mrb[13].mxu1 }
  0xf7   :  { %v189_v45 = vpop.f32.mrb[14].mxu0  ;;  %975 = vmatprep.mubr.msk.bf16.mxu1 %vm1092_vm0, %v1091_v0  ;;  %v245_v51 = vpop.f32.mrb[14].mxu1 }
  0xf8   :  { %v190_v48 = vadd.f32 %v1296_v49, %v189_v45  ;;  %v918_v50 = vpop.f32.mrb[15].mxu0  ;;  %v284_v52 = vmax.f32 %v243_v46, 0.0  ;;  %v246_v53 = vadd.f32 %v1296_v49, %v245_v51  ;;  %v946_v54 = vpop.f32.mrb[15].mxu1  ;;  %v270_v55 = vmax.f32 %v187_v42, 0.0 }
  0xfa   :  { %v271_v56 = vmax.f32 %v190_v48, 0.0  ;;  %v285_v57 = vmax.f32 %v246_v53, 0.0 }
  0xfc   :  { %v292_v58 = vpack.c.bf16 %v271_v56, %v270_v55  ;;  %v299_v60 = vpack.c.bf16 %v285_v57, %v284_v52 }
  0xfd   :  { %v194_v59 = vpop.f32.mrb[16].mxu0  ;;  %v250_v63 = vpop.f32.mrb[16].mxu1 }
  0xfe   :  { %v195_v61 = vadd.f32 %v1296_v49, %v194_v59  ;;  %v921_v62 = vpop.f32.mrb[17].mxu0  ;;  %976 = vmatmul.mubr.msk.bf16.gmra.mrb[36].mxu1 %vm341_vm2, %v292_v58  ;;  %v251_v2 = vadd.f32 %v1296_v49, %v250_v63  ;;  %v949_v3 = vpop.f32.mrb[17].mxu1 }
  0xff   :  { %v197_v1 = vpop.f32.mrb[18].mxu0  ;;  %979 = vmatprep.mubr.msk.bf16.mxu1 %vm1092_vm0, %v1091_v0  ;;  %v253_v7 = vpop.f32.mrb[18].mxu1 }
 0x100   :  { %v198_v4 = vadd.f32 %v1296_v49, %v197_v1  ;;  %v922_v6 = vpop.f32.mrb[19].mxu0  ;;  %v286_v8 = vmax.f32 %v251_v2, 0.0  ;;  %v254_v9 = vadd.f32 %v1296_v49, %v253_v7  ;;  %v950_v10 = vpop.f32.mrb[19].mxu1  ;;  %v272_v11 = vmax.f32 %v195_v61, 0.0 }
 0x102   :  { %v273_v12 = vmax.f32 %v198_v4, 0.0  ;;  %v287_v13 = vmax.f32 %v254_v9, 0.0 }
 0x104   :  { %v293_v14 = vpack.c.bf16 %v273_v12, %v272_v11  ;;  %v300_v16 = vpack.c.bf16 %v287_v13, %v286_v8 }
 0x105   :  { %v202_v15 = vpop.f32.mrb[20].mxu0  ;;  %v258_v19 = vpop.f32.mrb[20].mxu1 }
 0x106   :  { %v203_v17 = vadd.f32 %v1296_v49, %v202_v15  ;;  %v925_v18 = vpop.f32.mrb[21].mxu0  ;;  %980 = vmatmul.mubr.msk.bf16.gmra.mrb[40].mxu1 %vm341_vm2, %v293_v14  ;;  %v259_v21 = vadd.f32 %v1296_v49, %v258_v19  ;;  %v953_v22 = vpop.f32.mrb[21].mxu1 }
 0x107   :  { %v205_v20 = vpop.f32.mrb[22].mxu0  ;;  %983 = vmatprep.mubr.msk.bf16.mxu1 %vm1092_vm0, %v1091_v0  ;;  %v261_v26 = vpop.f32.mrb[22].mxu1 }
 0x108   :  { %v206_v24 = vadd.f32 %v1296_v49, %v205_v20  ;;  %v926_v25 = vpop.f32.mrb[23].mxu0  ;;  %v954_v27 = vpop.f32.mrb[23].mxu1  ;;  %v274_v28 = vmax.f32 %v203_v17, 0.0 }
 0x10a   :  { %v275_v29 = vmax.f32 %v206_v24, 0.0 }
 0x10c   :  { %v294_v30 = vpack.c.bf16 %v275_v29, %v274_v28 }
 0x10d   :  { %v210_v31 = vpop.f32.mrb[24].mxu0 }
 0x10e   :  { %v211_v32 = vadd.f32 %v1296_v49, %v210_v31  ;;  %v929_v33 = vpop.f32.mrb[25].mxu0  ;;  %984 = vmatmul.mubr.msk.bf16.gmra.mrb[44].mxu1 %vm341_vm2, %v294_v30 }
 0x10f   :  { %v213_v34 = vpop.f32.mrb[26].mxu0  ;;  %987 = vmatprep.mubr.msk.bf16.mxu1 %vm1092_vm0, %v1091_v0 }
 0x110   :  { %v214_v35 = vadd.f32 %v1296_v49, %v213_v34  ;;  %v930_v36 = vpop.f32.mrb[27].mxu0  ;;  %v276_v37 = vmax.f32 %v211_v32, 0.0  ;;  %v288_v49 = vmax.f32 %v259_v21, 0.0 }
 0x112   :  { %v277_v38 = vmax.f32 %v214_v35, 0.0 }
 0x114   :  { %v295_v39 = vpack.c.bf16 %v277_v38, %v276_v37 }
 0x116   :  { %988 = vmatmul.mubr.msk.bf16.gmra.mrb[48].mxu1 %vm341_vm2, %v295_v39 }
 0x117   :  { %991 = vmatprep.mubr.msk.bf16.mxu1 %vm1092_vm0, %v1091_v0 }
 0x11e   :  { %992 = vmatmul.mubr.msk.bf16.gmra.mrb[52].mxu1 %vm341_vm2, %v1302_v5  ;;  %v301_v5 = vpack.c.bf16 %v288_v49, %v288_v49 }
 0x11f   :  { %995 = vmatprep.mubr.msk.bf16.mxu1 %vm1092_vm0, %v1091_v0 }
 0x126   :  { %996 = vmatmul.mubr.msk.bf16.gmra.mrb[56].mxu1 %vm341_vm2, %v1311_v23  ;;  %v1372_v23 = vld [vmem:[%s1571_s4] ss:$0 sm:$0xff] }
 0x127   :  { %999 = vmatprep.mubr.msk.bf16.mxu1 %vm1092_vm0, %v1091_v0 }
 0x12e   :  { %1000 = vmatmul.mubr.msk.bf16.gmra.mrb[60].mxu1 %vm341_vm2, %v1320_v41 }
 0x12f   :  { %1003 = vmatprep.mubr.msk.bf16.mxu1 %vm1092_vm0, %v1091_v0 }
 0x136   :  { %1004 = vmatmul.mubr.msk.bf16.gmra.mrb[64].mxu1 %vm341_vm2, %v299_v60 }
 0x137   :  { %1007 = vmatprep.mubr.msk.bf16.mxu1 %vm1092_vm0, %v1091_v0 }
 0x13e   :  { %1008 = vmatmul.mubr.msk.bf16.gmra.mrb[68].mxu1 %vm341_vm2, %v300_v16 }
 0x13f   :  { %1011 = vmatprep.mubr.msk.bf16.mxu1 %vm1092_vm0, %v1091_v0 }
 0x146   :  { %1012 = vmatmul.mubr.msk.bf16.gmra.mrb[72].mxu1 %vm341_vm2, %v301_v5 }
 0x1b9   :  { %v415_v40 = vpop.f32.mrb[24].mxu1 }
 0x1ba   :  { %v416_v41 = vadd.f32 %v1372_v23, %v415_v40  ;;  %v965_v42 = vpop.f32.mrb[25].mxu1 }
 0x1bb   :  { %v418_v43 = vpop.f32.mrb[26].mxu1 }
 0x1bc   :  { %v419_v44 = vadd.f32 %v1372_v23, %v418_v43  ;;  %v966_v45 = vpop.f32.mrb[27].mxu1  ;;  %v517_v46 = vmax.f32 %v416_v41, 0.0 }
 0x1be   :  { %v518_v47 = vmax.f32 %v419_v44, 0.0 }
 0x1c0   :  { %v542_v48 = vpack.c.bf16 %v518_v47, %v517_v46 }
 0x1c1   :  { %v423_v50 = vpop.f32.mrb[28].mxu1 }
 0x1c2   :  { %v424_v51 = vadd.f32 %v1372_v23, %v423_v50  ;;  %v969_v52 = vpop.f32.mrb[29].mxu1  ;;  %1024 = vmatmul.mubr.msk.bf16.vlgmr.msra.gmra.mrb[28].mxu0 %vm341_vm2, %v542_v48 }
 0x1c3   :  { %v426_v53 = vpop.f32.mrb[30].mxu1  ;;  %1027 = vmatprep.mubr.msk.bf16.mxu0 %vm1092_vm0, %v1091_v0 }
 0x1c4   :  { %v427_v54 = vadd.f32 %v1372_v23, %v426_v53  ;;  %v970_v55 = vpop.f32.mrb[31].mxu1  ;;  %v519_v56 = vmax.f32 %v424_v51, 0.0 }
 0x1c6   :  { %v520_v57 = vmax.f32 %v427_v54, 0.0 }
 0x1c8   :  { %v543_v58 = vpack.c.bf16 %v520_v57, %v519_v56 }
 0x1c9   :  { %v431_v59 = vpop.f32.mrb[32].mxu1 }
 0x1ca   :  { %v432_v60 = vadd.f32 %v1372_v23, %v431_v59  ;;  %v973_v61 = vpop.f32.mrb[33].mxu1  ;;  %1028 = vmatmul.mubr.msk.bf16.gmra.mrb[32].mxu0 %vm341_vm2, %v543_v58 }
 0x1cb   :  { %v434_v62 = vpop.f32.mrb[34].mxu1  ;;  %1031 = vmatprep.mubr.msk.bf16.mxu0 %vm1092_vm0, %v1091_v0 }
 0x1cc   :  { %v435_v63 = vadd.f32 %v1372_v23, %v434_v62  ;;  %v974_v1 = vpop.f32.mrb[35].mxu1  ;;  %v521_v2 = vmax.f32 %v432_v60, 0.0 }
 0x1ce   :  { %v522_v3 = vmax.f32 %v435_v63, 0.0 }
 0x1d0   :  { %v544_v4 = vpack.c.bf16 %v522_v3, %v521_v2 }
 0x1d1   :  { %v439_v6 = vpop.f32.mrb[36].mxu1 }
 0x1d2   :  { %v440_v7 = vadd.f32 %v1372_v23, %v439_v6  ;;  %v977_v8 = vpop.f32.mrb[37].mxu1  ;;  %1032 = vmatmul.mubr.msk.bf16.gmra.mrb[36].mxu0 %vm341_vm2, %v544_v4 }
 0x1d3   :  { %v442_v9 = vpop.f32.mrb[38].mxu1  ;;  %1035 = vmatprep.mubr.msk.bf16.mxu0 %vm1092_vm0, %v1091_v0 }
 0x1d4   :  { %v443_v10 = vadd.f32 %v1372_v23, %v442_v9  ;;  %v978_v11 = vpop.f32.mrb[39].mxu1  ;;  %v523_v12 = vmax.f32 %v440_v7, 0.0 }
 0x1d6   :  { %v524_v13 = vmax.f32 %v443_v10, 0.0 }
 0x1d8   :  { %v545_v14 = vpack.c.bf16 %v524_v13, %v523_v12 }
 0x1d9   :  { %v447_v15 = vpop.f32.mrb[40].mxu1 }
 0x1da   :  { %v448_v16 = vadd.f32 %v1372_v23, %v447_v15  ;;  %v981_v17 = vpop.f32.mrb[41].mxu1  ;;  %1036 = vmatmul.mubr.msk.bf16.gmra.mrb[40].mxu0 %vm341_vm2, %v545_v14 }
 0x1db   :  { %v450_v18 = vpop.f32.mrb[42].mxu1  ;;  %1039 = vmatprep.mubr.msk.bf16.mxu0 %vm1092_vm0, %v1091_v0 }
 0x1dc   :  { %v451_v19 = vadd.f32 %v1372_v23, %v450_v18  ;;  %v982_v20 = vpop.f32.mrb[43].mxu1  ;;  %v525_v21 = vmax.f32 %v448_v16, 0.0 }
 0x1de   :  { %v526_v22 = vmax.f32 %v451_v19, 0.0 }
 0x1e0   :  { %v546_v24 = vpack.c.bf16 %v526_v22, %v525_v21 }
 0x1e1   :  { %v455_v25 = vpop.f32.mrb[44].mxu1 }
 0x1e2   :  { %v456_v26 = vadd.f32 %v1372_v23, %v455_v25  ;;  %v985_v27 = vpop.f32.mrb[45].mxu1  ;;  %1040 = vmatmul.mubr.msk.bf16.gmra.mrb[44].mxu0 %vm341_vm2, %v546_v24 }
 0x1e3   :  { %v458_v28 = vpop.f32.mrb[46].mxu1  ;;  %1043 = vmatprep.mubr.msk.bf16.mxu0 %vm1092_vm0, %v1091_v0 }
 0x1e4   :  { %v459_v29 = vadd.f32 %v1372_v23, %v458_v28  ;;  %v986_v30 = vpop.f32.mrb[47].mxu1  ;;  %v527_v31 = vmax.f32 %v456_v26, 0.0 }
 0x1e6   :  { %v528_v32 = vmax.f32 %v459_v29, 0.0 }
 0x1e8   :  { %v547_v33 = vpack.c.bf16 %v528_v32, %v527_v31 }
 0x1e9   :  { %v463_v34 = vpop.f32.mrb[48].mxu1 }
 0x1ea   :  { %v464_v35 = vadd.f32 %v1372_v23, %v463_v34  ;;  %v989_v36 = vpop.f32.mrb[49].mxu1  ;;  %1044 = vmatmul.mubr.msk.bf16.gmra.mrb[48].mxu0 %vm341_vm2, %v547_v33  ;;  %v1439_v33 = vld [vmem:[%s1572_s6] ss:$0 sm:$0xff] }
 0x1eb   :  { %v466_v37 = vpop.f32.mrb[50].mxu1  ;;  %1047 = vmatprep.mubr.msk.bf16.mxu0 %vm1092_vm0, %v1091_v0 }
 0x1ec   :  { %v467_v38 = vadd.f32 %v1372_v23, %v466_v37  ;;  %v990_v39 = vpop.f32.mrb[51].mxu1  ;;  %v529_v49 = vmax.f32 %v464_v35, 0.0 }
 0x1ee   :  { %v530_v5 = vmax.f32 %v467_v38, 0.0 }
 0x1f0   :  { %v548_v40 = vpack.c.bf16 %v530_v5, %v529_v49 }
 0x1f1   :  { %v471_v41 = vpop.f32.mrb[52].mxu1 }
 0x1f2   :  { %v472_v42 = vadd.f32 %v1372_v23, %v471_v41  ;;  %v993_v43 = vpop.f32.mrb[53].mxu1  ;;  %1048 = vmatmul.mubr.msk.bf16.gmra.mrb[52].mxu0 %vm341_vm2, %v548_v40 }
 0x1f3   :  { %v474_v44 = vpop.f32.mrb[54].mxu1  ;;  %1051 = vmatprep.mubr.msk.bf16.mxu0 %vm1092_vm0, %v1091_v0 }
 0x1f4   :  { %v475_v45 = vadd.f32 %v1372_v23, %v474_v44  ;;  %v994_v46 = vpop.f32.mrb[55].mxu1  ;;  %v531_v47 = vmax.f32 %v472_v42, 0.0 }
 0x1f6   :  { %v532_v48 = vmax.f32 %v475_v45, 0.0 }
 0x1f8   :  { %v549_v50 = vpack.c.bf16 %v532_v48, %v531_v47 }
 0x1f9   :  { %v479_v51 = vpop.f32.mrb[56].mxu1 }
 0x1fa   :  { %v480_v52 = vadd.f32 %v1372_v23, %v479_v51  ;;  %v997_v53 = vpop.f32.mrb[57].mxu1  ;;  %1052 = vmatmul.mubr.msk.bf16.gmra.mrb[56].mxu0 %vm341_vm2, %v549_v50 }
 0x1fb   :  { %v482_v54 = vpop.f32.mrb[58].mxu1  ;;  %1055 = vmatprep.mubr.msk.bf16.mxu0 %vm1092_vm0, %v1091_v0 }
 0x1fc   :  { %v483_v55 = vadd.f32 %v1372_v23, %v482_v54  ;;  %v998_v56 = vpop.f32.mrb[59].mxu1  ;;  %v533_v57 = vmax.f32 %v480_v52, 0.0 }
 0x1fe   :  { %v534_v58 = vmax.f32 %v483_v55, 0.0 }
 0x200   :  { %v550_v59 = vpack.c.bf16 %v534_v58, %v533_v57 }
 0x201   :  { %v487_v60 = vpop.f32.mrb[60].mxu1 }
 0x202   :  { %v488_v61 = vadd.f32 %v1372_v23, %v487_v60  ;;  %v1001_v62 = vpop.f32.mrb[61].mxu1  ;;  %1056 = vmatmul.mubr.msk.bf16.gmra.mrb[60].mxu0 %vm341_vm2, %v550_v59 }
 0x203   :  { %v490_v63 = vpop.f32.mrb[62].mxu1  ;;  %1059 = vmatprep.mubr.msk.bf16.mxu0 %vm1092_vm0, %v1091_v0 }
 0x204   :  { %v491_v1 = vadd.f32 %v1372_v23, %v490_v63  ;;  %v1002_v2 = vpop.f32.mrb[63].mxu1  ;;  %v535_v3 = vmax.f32 %v488_v61, 0.0 }
 0x206   :  { %v536_v4 = vmax.f32 %v491_v1, 0.0 }
 0x208   :  { %v551_v6 = vpack.c.bf16 %v536_v4, %v535_v3 }
 0x209   :  { %v495_v7 = vpop.f32.mrb[64].mxu1 }
 0x20a   :  { %v496_v8 = vadd.f32 %v1372_v23, %v495_v7  ;;  %v1005_v9 = vpop.f32.mrb[65].mxu1  ;;  %1060 = vmatmul.mubr.msk.bf16.gmra.mrb[64].mxu0 %vm341_vm2, %v551_v6 }
 0x20b   :  { %v498_v10 = vpop.f32.mrb[66].mxu1  ;;  %1063 = vmatprep.mubr.msk.bf16.mxu0 %vm1092_vm0, %v1091_v0 }
 0x20c   :  { %v499_v11 = vadd.f32 %v1372_v23, %v498_v10  ;;  %v1006_v12 = vpop.f32.mrb[67].mxu1  ;;  %v537_v13 = vmax.f32 %v496_v8, 0.0 }
 0x20e   :  { %v538_v14 = vmax.f32 %v499_v11, 0.0 }
 0x210   :  { %v552_v15 = vpack.c.bf16 %v538_v14, %v537_v13 }
 0x211   :  { %v503_v16 = vpop.f32.mrb[68].mxu1 }
 0x212   :  { %v504_v17 = vadd.f32 %v1372_v23, %v503_v16  ;;  %v1009_v18 = vpop.f32.mrb[69].mxu1  ;;  %1064 = vmatmul.mubr.msk.bf16.gmra.mrb[68].mxu0 %vm341_vm2, %v552_v15 }
 0x213   :  { %v506_v19 = vpop.f32.mrb[70].mxu1  ;;  %1067 = vmatprep.mubr.msk.bf16.mxu0 %vm1092_vm0, %v1091_v0 }
 0x214   :  { %v507_v20 = vadd.f32 %v1372_v23, %v506_v19  ;;  %v1010_v21 = vpop.f32.mrb[71].mxu1  ;;  %v539_v22 = vmax.f32 %v504_v17, 0.0 }
 0x216   :  { %v540_v24 = vmax.f32 %v507_v20, 0.0 }
 0x218   :  { %v553_v25 = vpack.c.bf16 %v540_v24, %v539_v22 }
 0x219   :  { %v511_v26 = vpop.f32.mrb[72].mxu1 }
 0x21a   :  { %v512_v27 = vadd.f32 %v1372_v23, %v511_v26  ;;  %v1013_v28 = vpop.f32.mrb[73].mxu1  ;;  %1068 = vmatmul.mubr.msk.bf16.gmra.mrb[72].mxu0 %vm341_vm2, %v553_v25 }
 0x21b   :  { %v514_v29 = vpop.f32.mrb[74].mxu1  ;;  %1071 = vmatprep.mubr.msk.bf16.mxu0 %vm1092_vm0, %v1091_v0 }
 0x21c   :  { %v541_v30 = vmax.f32 %v512_v27, 0.0  ;;  %v1014_v31 = vpop.f32.mrb[75].mxu1 }
 0x21e   :  { %v554_v32 = vpack.c.bf16 %v541_v30, %v541_v30 }
 0x222   :  { %1072 = vmatmul.mubr.msk.bf16.gmra.mrb[76].mxu0 %vm341_vm2, %v554_v32 }
 0x295   :  { %v667_v34 = vpop.f32.mrb[28].mxu0 }
 0x296   :  { %v668_v23 = vadd.f32 %v1439_v33, %v667_v34  ;;  %v1025_v35 = vpop.f32.mrb[29].mxu0 }
 0x297   :  { %v670_v36 = vpop.f32.mrb[30].mxu0 }
 0x298   :  { %769 = vst.msk [vmem:[%s1573_s7] sm:$0xff] %vm88_vm1, %v668_v23  ;;  %v671_v0 = vadd.f32 %v1439_v33, %v670_v36  ;;  %v1026_v37 = vpop.f32.mrb[31].mxu0 }
 0x29a   :  { %770 = vst.msk [vmem:[%s1573_s7 + $0x8] sm:$0xff] %vm88_vm1, %v671_v0 }
 0x29d   :  { %v675_v38 = vpop.f32.mrb[32].mxu0 }
 0x29e   :  { %v676_v39 = vadd.f32 %v1439_v33, %v675_v38  ;;  %v1029_v49 = vpop.f32.mrb[33].mxu0 }
 0x29f   :  { %v678_v5 = vpop.f32.mrb[34].mxu0 }
 0x2a0   :  { %771 = vst.msk [vmem:[%s1573_s7 + $0x10] sm:$0xff] %vm88_vm1, %v676_v39  ;;  %v679_v40 = vadd.f32 %v1439_v33, %v678_v5  ;;  %v1030_v41 = vpop.f32.mrb[35].mxu0 }
 0x2a2   :  { %772 = vst.msk [vmem:[%s1573_s7 + $0x18] sm:$0xff] %vm88_vm1, %v679_v40 }
 0x2a5   :  { %v683_v42 = vpop.f32.mrb[36].mxu0 }
 0x2a6   :  { %v684_v43 = vadd.f32 %v1439_v33, %v683_v42  ;;  %v1033_v44 = vpop.f32.mrb[37].mxu0 }
 0x2a7   :  { %v686_v45 = vpop.f32.mrb[38].mxu0 }
 0x2a8   :  { %773 = vst.msk [vmem:[%s1573_s7 + $0x20] sm:$0xff] %vm88_vm1, %v684_v43  ;;  %v687_v46 = vadd.f32 %v1439_v33, %v686_v45  ;;  %v1034_v47 = vpop.f32.mrb[39].mxu0 }
 0x2aa   :  { %774 = vst.msk [vmem:[%s1573_s7 + $0x28] sm:$0xff] %vm88_vm1, %v687_v46 }
 0x2ad   :  { %v691_v48 = vpop.f32.mrb[40].mxu0 }
 0x2ae   :  { %v692_v50 = vadd.f32 %v1439_v33, %v691_v48  ;;  %v1037_v51 = vpop.f32.mrb[41].mxu0 }
 0x2af   :  { %v694_v52 = vpop.f32.mrb[42].mxu0 }
 0x2b0   :  { %775 = vst.msk [vmem:[%s1573_s7 + $0x30] sm:$0xff] %vm88_vm1, %v692_v50  ;;  %v695_v53 = vadd.f32 %v1439_v33, %v694_v52  ;;  %v1038_v54 = vpop.f32.mrb[43].mxu0 }
 0x2b2   :  { %776 = vst.msk [vmem:[%s1573_s7 + $0x38] sm:$0xff] %vm88_vm1, %v695_v53 }
 0x2b5   :  { %v699_v55 = vpop.f32.mrb[44].mxu0 }
 0x2b6   :  { %v700_v56 = vadd.f32 %v1439_v33, %v699_v55  ;;  %v1041_v57 = vpop.f32.mrb[45].mxu0 }
 0x2b7   :  { %v702_v58 = vpop.f32.mrb[46].mxu0 }
 0x2b8   :  { %777 = vst.msk [vmem:[%s1573_s7 + $0x40] sm:$0xff] %vm88_vm1, %v700_v56  ;;  %v703_v59 = vadd.f32 %v1439_v33, %v702_v58  ;;  %v1042_v60 = vpop.f32.mrb[47].mxu0 }
 0x2ba   :  { %778 = vst.msk [vmem:[%s1573_s7 + $0x48] sm:$0xff] %vm88_vm1, %v703_v59 }
 0x2bd   :  { %v707_v61 = vpop.f32.mrb[48].mxu0 }
 0x2be   :  { %v708_v62 = vadd.f32 %v1439_v33, %v707_v61  ;;  %v1045_v63 = vpop.f32.mrb[49].mxu0 }
 0x2bf   :  { %v710_v1 = vpop.f32.mrb[50].mxu0 }
 0x2c0   :  { %779 = vst.msk [vmem:[%s1573_s7 + $0x50] sm:$0xff] %vm88_vm1, %v708_v62  ;;  %v711_v2 = vadd.f32 %v1439_v33, %v710_v1  ;;  %v1046_v3 = vpop.f32.mrb[51].mxu0 }
 0x2c2   :  { %780 = vst.msk [vmem:[%s1573_s7 + $0x58] sm:$0xff] %vm88_vm1, %v711_v2 }
 0x2c5   :  { %v715_v4 = vpop.f32.mrb[52].mxu0 }
 0x2c6   :  { %v716_v6 = vadd.f32 %v1439_v33, %v715_v4  ;;  %v1049_v7 = vpop.f32.mrb[53].mxu0 }
 0x2c7   :  { %v718_v8 = vpop.f32.mrb[54].mxu0 }
 0x2c8   :  { %781 = vst.msk [vmem:[%s1573_s7 + $0x60] sm:$0xff] %vm88_vm1, %v716_v6  ;;  %v719_v9 = vadd.f32 %v1439_v33, %v718_v8  ;;  %v1050_v10 = vpop.f32.mrb[55].mxu0 }
 0x2ca   :  { %782 = vst.msk [vmem:[%s1573_s7 + $0x68] sm:$0xff] %vm88_vm1, %v719_v9 }
 0x2cd   :  { %v723_v11 = vpop.f32.mrb[56].mxu0 }
 0x2ce   :  { %v724_v12 = vadd.f32 %v1439_v33, %v723_v11  ;;  %v1053_v13 = vpop.f32.mrb[57].mxu0 }
 0x2cf   :  { %v726_v14 = vpop.f32.mrb[58].mxu0 }
 0x2d0   :  { %783 = vst.msk [vmem:[%s1573_s7 + $0x70] sm:$0xff] %vm88_vm1, %v724_v12  ;;  %v727_v15 = vadd.f32 %v1439_v33, %v726_v14  ;;  %v1054_v16 = vpop.f32.mrb[59].mxu0 }
 0x2d2   :  { %784 = vst.msk [vmem:[%s1573_s7 + $0x78] sm:$0xff] %vm88_vm1, %v727_v15 }
 0x2d5   :  { %v731_v17 = vpop.f32.mrb[60].mxu0 }
 0x2d6   :  { %v732_v18 = vadd.f32 %v1439_v33, %v731_v17  ;;  %v1057_v19 = vpop.f32.mrb[61].mxu0 }
 0x2d7   :  { %v734_v20 = vpop.f32.mrb[62].mxu0 }
 0x2d8   :  { %785 = vst.msk [vmem:[%s1573_s7 + $0x80] sm:$0xff] %vm88_vm1, %v732_v18  ;;  %v735_v21 = vadd.f32 %v1439_v33, %v734_v20  ;;  %v1058_v22 = vpop.f32.mrb[63].mxu0 }
 0x2da   :  { %786 = vst.msk [vmem:[%s1573_s7 + $0x88] sm:$0xff] %vm88_vm1, %v735_v21 }
 0x2dd   :  { %v739_v24 = vpop.f32.mrb[64].mxu0 }
 0x2de   :  { %v740_v25 = vadd.f32 %v1439_v33, %v739_v24  ;;  %v1061_v26 = vpop.f32.mrb[65].mxu0 }
 0x2df   :  { %v742_v27 = vpop.f32.mrb[66].mxu0 }
 0x2e0   :  { %787 = vst.msk [vmem:[%s1573_s7 + $0x90] sm:$0xff] %vm88_vm1, %v740_v25  ;;  %v743_v28 = vadd.f32 %v1439_v33, %v742_v27  ;;  %v1062_v29 = vpop.f32.mrb[67].mxu0 }
 0x2e2   :  { %788 = vst.msk [vmem:[%s1573_s7 + $0x98] sm:$0xff] %vm88_vm1, %v743_v28 }
 0x2e5   :  { %v747_v30 = vpop.f32.mrb[68].mxu0 }
 0x2e6   :  { %v748_v31 = vadd.f32 %v1439_v33, %v747_v30  ;;  %v1065_v32 = vpop.f32.mrb[69].mxu0 }
 0x2e7   :  { %v750_v34 = vpop.f32.mrb[70].mxu0 }
 0x2e8   :  { %789 = vst.msk [vmem:[%s1573_s7 + $0xa0] sm:$0xff] %vm88_vm1, %v748_v31  ;;  %v751_v23 = vadd.f32 %v1439_v33, %v750_v34  ;;  %v1066_v35 = vpop.f32.mrb[71].mxu0 }
 0x2ea   :  { %790 = vst.msk [vmem:[%s1573_s7 + $0xa8] sm:$0xff] %vm88_vm1, %v751_v23 }
 0x2ed   :  { %v755_v36 = vpop.f32.mrb[72].mxu0 }
 0x2ee   :  { %v756_v0 = vadd.f32 %v1439_v33, %v755_v36  ;;  %v1069_v37 = vpop.f32.mrb[73].mxu0 }
 0x2ef   :  { %v758_v38 = vpop.f32.mrb[74].mxu0 }
 0x2f0   :  { %791 = vst.msk [vmem:[%s1573_s7 + $0xb0] sm:$0xff] %vm88_vm1, %v756_v0  ;;  %v759_v39 = vadd.f32 %v1439_v33, %v758_v38  ;;  %v1070_v49 = vpop.f32.mrb[75].mxu0 }
 0x2f2   :  { %792 = vst.msk [vmem:[%s1573_s7 + $0xb8] sm:$0xff] %vm88_vm1, %v759_v39 }
 0x2f5   :  { %v763_v5 = vpop.f32.mrb[76].mxu0 }
 0x2f6   :  { %v764_v40 = vadd.f32 %v1439_v33, %v763_v5  ;;  %v1073_v41 = vpop.f32.mrb[77].mxu0 }
 0x2f7   :  { %v766_v42 = vpop.f32.mrb[78].mxu0 }
 0x2f8   :  { %793 = vst.msk [vmem:[%s1573_s7 + $0xc0] sm:$0xff] %vm88_vm1, %v764_v40  ;;  %v1074_v43 = vpop.f32.mrb[79].mxu0 }

</bundles_post_ra>
